<compile_context>
chip_gen: v5e
topology: v5e:2x2
jax: 0.10.0
libtpu: 0.0.40
codegen_flags: <defaults>
</compile_context>

<pallas_src>
import jax
import jax.numpy as jnp
from jax.experimental import pallas as pl
from jax.experimental.pallas import tpu as pltpu


LANE = 128      # lane width: K-tile granularity when the reduction is tiled
SUBLANE = 8     # sublane width: batch-tile granularity
MAX_TB = 2048   # batch-tile cap (amortizes ~0.35 us/step overhead)


def _round_up(n: int, m: int) -> int:
    return ((n + m - 1) // m) * m


def _vmem_budget_bytes():
    """Generation-aware (v5e/v6e: 128 MiB, v7x: 64 MiB) VMEM budget/limit."""
    try:
        cap = int(pltpu.get_tpu_info().vmem_capacity_bytes)
    except Exception:
        cap = 64 * 1024 * 1024          # conservative fallback: v7x per-TC VMEM
    cap = max(32 * 1024 * 1024, min(cap, 128 * 1024 * 1024))
    tile_budget = cap // 2              # target working-set for tile selection
    vmem_limit = min(int(cap * 0.85), cap - 8 * 1024 * 1024)
    return tile_budget, vmem_limit


def temperature_scaler_kernel(temp_ref, x_ref, w_ref, b_ref, o_ref, acc_ref):
    # temp_ref : SMEM (1,)       -- temperature parameter
    # x_ref    : VMEM (tb, tk)   -- input batch tile (pipelined)
    # w_ref    : VMEM (tk, C)    -- weight tile (resident if single K step)
    # b_ref    : VMEM (1,  C)    -- bias (resident, single-buffered)
    # o_ref    : VMEM (tb, C)    -- sigmoid(logits / T)
    # acc_ref  : VMEM (tb, C) f32 scratch accumulator (persists across K axis)
    k = pl.program_id(1)

    @pl.when(k == 0)
    def _():
        acc_ref[...] = jnp.zeros_like(acc_ref)

    acc_ref[...] += jnp.dot(x_ref[...], w_ref[...],
                            preferred_element_type=jnp.float32)

    @pl.when(k == pl.num_programs(1) - 1)
    def _():
        logits = acc_ref[...] + b_ref[...]          # (1, C) broadcasts to (tb, C)
        # sigmoid(z/T) = 0.5*tanh(z * (0.5/T)) + 0.5 : one exact scalar divide
        # (off the vector critical path) + one EUP tanh, no per-element extra mul.
        half_inv_t = 0.5 / temp_ref[0]
        o_ref[...] = (0.5 * jnp.tanh(logits * half_inv_t) + 0.5).astype(o_ref.dtype)


def temperature_scaler_forward(x, w, b, temperature, *, use_bf16=True,
                               out_dtype=jnp.float32, tb=None, tk=None):
    """Fused forward: sigmoid((x @ w + b) / temperature).

    x: (B, D) activations, w: (D, C) weights, b: (C,) bias,
    temperature: (1,) learnable scalar.  Returns (B, C) probabilities.
    """
    B, D = x.shape
    D2, C = w.shape
    assert D == D2 and b.shape == (C,)

    in_dtype = jnp.bfloat16 if use_bf16 else jnp.float32
    in_bytes = jnp.dtype(in_dtype).itemsize
    out_bytes = jnp.dtype(out_dtype).itemsize
    tile_budget, vmem_limit = _vmem_budget_bytes()

    # ---- K (reduction) tiling ---------------------------------------------
    if tk is None:
        w_resident = D * C * in_bytes                 # single-buffered resident W
        if w_resident <= tile_budget // 2:
            tk = D                                    # whole reduction in one step
        else:
            # double-buffered (tk, C) W tiles capped at half the budget
            tk = (tile_budget // 2) // max(2 * C * in_bytes, 1)
            tk = max((tk // LANE) * LANE, LANE)
    single_k = tk >= D
    if single_k:
        tk = D
        Dp = D
        w_bytes = D * C * in_bytes                    # Buffered(1): resident once
    else:
        assert tk % LANE == 0, "K tile must be a multiple of 128"
        Dp = _round_up(D, tk)
        w_bytes = 2 * tk * C * in_bytes               # pipelined, double-buffered
    n_k = Dp // tk
    # TODO(synk): very large C (fixed + per-row bytes over budget) would need a
    # C-tiling grid axis as well; the footprint assert below catches that case.

    # ---- batch tiling (minimize padding, allow megacore split) -------------
    fixed_bytes = w_bytes + C * 4                                  # W + bias(f32)
    per_row = 2 * tk * in_bytes + 2 * C * out_bytes + C * 4        # x + out + acc
    if tb is None:
        tb_cap = max((tile_budget - fixed_bytes) // per_row, SUBLANE)
        tb_cap = max((tb_cap // SUBLANE) * SUBLANE, SUBLANE)
        tb_cap = min(tb_cap, MAX_TB)
        n_b = pl.cdiv(B, tb_cap)
        if n_b == 1 and B > SUBLANE:
            n_b = 2                       # >=2 grid steps -> both v7x TCs busy
        tb = min(_round_up(pl.cdiv(B, n_b), SUBLANE), tb_cap)
    tb = max(_round_up(tb, SUBLANE), SUBLANE)
    Bp = _round_up(B, tb)
    n_b = Bp // tb

    footprint = fixed_bytes + tb * per_row
    assert footprint <= vmem_limit, (
        f"VMEM tile footprint {footprint / 2**20:.1f} MiB exceeds limit "
        f"{vmem_limit / 2**20:.1f} MiB; reduce tb/tk.")

    # ---- prepare operands (pad / cast only when actually required) ---------
    if (Bp, Dp) != (B, D):
        x_p = jnp.zeros((Bp, Dp), in_dtype).at[:B, :D].set(x.astype(in_dtype))
    elif x.dtype != in_dtype:
        x_p = x.astype(in_dtype)
    else:
        x_p = x
    if Dp != D:
        w_p = jnp.zeros((Dp, C), in_dtype).at[:D, :].set(w.astype(in_dtype))
    elif w.dtype != in_dtype:
        w_p = w.astype(in_dtype)
    else:
        w_p = w
    b_p = jnp.reshape(b, (1, C)).astype(jnp.float32)
    t = jnp.reshape(temperature, (1,)).astype(jnp.float32)

    if single_k:
        # Constant block index -> keep a single resident copy in VMEM.
        w_spec = pl.BlockSpec((tk, C), lambda i, k: (0, 0),
                              pipeline_mode=pl.Buffered(1))
    else:
        w_spec = pl.BlockSpec((tk, C), lambda i, k: (k, 0))

    out_p = pl.pallas_call(
        temperature_scaler_kernel,
        out_shape=jax.ShapeDtypeStruct((Bp, C), out_dtype),
        grid_spec=pltpu.PrefetchScalarGridSpec(
            num_scalar_prefetch=0,
            grid=(n_b, n_k),
            in_specs=[
                pl.BlockSpec(memory_space=pltpu.SMEM),          # temperature (1,)
                pl.BlockSpec((tb, tk), lambda i, k: (i, k)),    # x tile (pipelined)
                w_spec,                                          # W
                pl.BlockSpec((1, C), lambda i, k: (0, 0),
                             pipeline_mode=pl.Buffered(1)),      # bias (resident)
            ],
            out_specs=pl.BlockSpec((tb, C), lambda i, k: (i, 0)),
            scratch_shapes=[pltpu.VMEM((tb, C), jnp.float32)],   # f32 accumulator
        ),
        compiler_params=pltpu.CompilerParams(
            dimension_semantics=("parallel", "arbitrary"),
            vmem_limit_bytes=vmem_limit,
        ),
    )(t, x_p, w_p, b_p)

    return out_p if Bp == B else out_p[:B]


if __name__ == "__main__":
    key = jax.random.PRNGKey(0)
    kx, kw, kb, kx2, kx3, kw3, kb3 = jax.random.split(key, 7)

    # nn.Parameter(torch.ones(1) * 1.5)
    temperature = jnp.ones((1,), dtype=jnp.float32) * 1.5

    # --- Test 1: small demo (B=8, D=32, C=4), default bf16 matmul inputs ----
    B, D, C = 8, 32, 4
    x = jax.random.normal(kx, (B, D), dtype=jnp.float32)
    w = jax.random.normal(kw, (D, C), dtype=jnp.float32) * 0.1
    b = jax.random.normal(kb, (C,), dtype=jnp.float32) * 0.1

    out = jax.block_until_ready(temperature_scaler_forward(x, w, b, temperature))
    ref = jax.nn.sigmoid((x @ w + b) / temperature[0])
    assert out.shape == (B, C)
    assert jnp.allclose(out, ref, atol=2e-2, rtol=2e-2), "mismatch vs reference (bf16)"

    # --- Test 2: batch not a multiple of the tile -> multi-step batch grid ---
    B2 = 24
    x2 = jax.random.normal(kx2, (B2, D), dtype=jnp.float32)
    out2 = jax.block_until_ready(temperature_scaler_forward(x2, w, b, temperature))
    ref2 = jax.nn.sigmoid((x2 @ w + b) / temperature[0])
    assert out2.shape == (B2, C)
    assert jnp.allclose(out2, ref2, atol=2e-2, rtol=2e-2), "tiled mismatch vs reference"

    # --- Test 3: f32 path + K-tiled reduction with padded D (D=200, tk=128) --
    B3, D3 = 16, 200
    x3 = jax.random.normal(kx3, (B3, D3), dtype=jnp.float32)
    w3 = jax.random.normal(kw3, (D3, C), dtype=jnp.float32) * 0.1
    b3 = jax.random.normal(kb3, (C,), dtype=jnp.float32) * 0.1
    out3 = jax.block_until_ready(
        temperature_scaler_forward(x3, w3, b3, temperature, use_bf16=False, tk=128))
    ref3 = jax.nn.sigmoid((x3 @ w3 + b3) / temperature[0])
    assert out3.shape == (B3, C)
    assert jnp.allclose(out3, ref3, atol=1e-4, rtol=1e-4), "K-tiled mismatch vs reference"

    # TODO(synk): set_temperature (LBFGS tuning of T against focal/ECE loss on a
    # validation loader) is training-time host logic; only the forward is fused.
    print("KERNEL_OK")
</pallas_src>

<mosaic_0001>
module attributes {stable_mosaic.version = 11 : i64} {
  func.func @temperature_scaler_kernel(%arg0: i32, %arg1: i32, %arg2: memref<1xf32, #tpu.memory_space<smem>>, %arg3: memref<8x32xbf16, #tpu.memory_space<vmem>>, %arg4: memref<32x4xbf16, #tpu.memory_space<vmem>>, %arg5: memref<1x4xf32, #tpu.memory_space<vmem>>, %arg6: memref<8x4xf32, #tpu.memory_space<vmem>>, %arg7: memref<8x4xf32, #tpu.memory_space<vmem>>) attributes {dimension_semantics = [#tpu.dimension_semantics<parallel>, #tpu.dimension_semantics<arbitrary>], iteration_bounds = array<i64: 1, 1>, scalar_prefetch = 0 : i64, scratch_operands = 1 : i64, tpu.core_type = #tpu.core_type<tc>, window_params = [{transform_indices = @transform_0, window_bounds = array<i64: 1>}, {transform_indices = @transform_1, window_bounds = array<i64: 8, 32>}, {pipeline_mode = #tpu.pipeline_mode<synchronous>, transform_indices = @transform_2, window_bounds = array<i64: 32, 4>}, {pipeline_mode = #tpu.pipeline_mode<synchronous>, transform_indices = @transform_3, window_bounds = array<i64: 1, 4>}, {transform_indices = @transform_4, window_bounds = array<i64: 8, 4>}]} {
    %c0_i32 = arith.constant 0 : i32
    %0 = arith.cmpi eq, %arg1, %c0_i32 : i32
    %1 = arith.extui %0 : i1 to i32
    %c0_i32_0 = arith.constant 0 : i32
    %2 = arith.cmpi ne, %1, %c0_i32_0 : i32
    scf.if %2 {
      %cst_10 = arith.constant 0.000000e+00 : f32
      %12 = vector.broadcast %cst_10 : f32 to vector<8x4xf32>
      %c0_11 = arith.constant 0 : index
      %c0_12 = arith.constant 0 : index
      %13 = vector.load %arg7[%c0_11, %c0_12] : memref<8x4xf32, #tpu.memory_space<vmem>>, vector<8x4xf32>
      tpu.vector_store %arg7[%c0_11, %c0_12], %12 {strides = array<i32>} : memref<8x4xf32, #tpu.memory_space<vmem>>, vector<8x4xf32>,
    } else {
    }
    %c0 = arith.constant 0 : index
    %c0_1 = arith.constant 0 : index
    %3 = vector.load %arg7[%c0, %c0_1] : memref<8x4xf32, #tpu.memory_space<vmem>>, vector<8x4xf32>
    %c0_2 = arith.constant 0 : index
    %c0_3 = arith.constant 0 : index
    %4 = vector.load %arg3[%c0_2, %c0_3] : memref<8x32xbf16, #tpu.memory_space<vmem>>, vector<8x32xbf16>
    %c0_4 = arith.constant 0 : index
    %c0_5 = arith.constant 0 : index
    %5 = vector.load %arg4[%c0_4, %c0_5] : memref<32x4xbf16, #tpu.memory_space<vmem>>, vector<32x4xbf16>
    %cst = arith.constant dense<0.000000e+00> : vector<8x4xf32>
    %6 = tpu.matmul %4, %5, %cst {dimension_numbers = #tpu.dot_dimension_numbers<[1], [0], [0], [1], [0, 0, 1, 1], [], []>} : vector<8x32xbf16>, vector<32x4xbf16>, vector<8x4xf32> -> vector<8x4xf32>
    %7 = arith.addf %3, %6 : vector<8x4xf32>
    %c0_6 = arith.constant 0 : index
    %c0_7 = arith.constant 0 : index
    %8 = vector.load %arg7[%c0_6, %c0_7] : memref<8x4xf32, #tpu.memory_space<vmem>>, vector<8x4xf32>
    tpu.vector_store %arg7[%c0_6, %c0_7], %7 {strides = array<i32>} : memref<8x4xf32, #tpu.memory_space<vmem>>, vector<8x4xf32>,
    %c0_i32_8 = arith.constant 0 : i32
    %9 = arith.cmpi eq, %arg1, %c0_i32_8 : i32
    %10 = arith.extui %9 : i1 to i32
    %c0_i32_9 = arith.constant 0 : i32
    %11 = arith.cmpi ne, %10, %c0_i32_9 : i32
    scf.if %11 {
      %c0_10 = arith.constant 0 : index
      %c0_11 = arith.constant 0 : index
      %12 = vector.load %arg7[%c0_10, %c0_11] : memref<8x4xf32, #tpu.memory_space<vmem>>, vector<8x4xf32>
      %c0_12 = arith.constant 0 : index
      %c0_13 = arith.constant 0 : index
      %13 = vector.load %arg5[%c0_12, %c0_13] : memref<1x4xf32, #tpu.memory_space<vmem>>, vector<1x4xf32>
      %14 = vector.broadcast %13 : vector<1x4xf32> to vector<8x4xf32>
      %15 = arith.addf %12, %14 : vector<8x4xf32>
      %c0_14 = arith.constant 0 : index
      %16 = memref.load %arg2[%c0_14] : memref<1xf32, #tpu.memory_space<smem>>
      %cst_15 = arith.constant 5.000000e-01 : f32
      %17 = arith.divf %cst_15, %16 : f32
      %18 = vector.broadcast %17 : f32 to vector<8x4xf32>
      %19 = arith.mulf %15, %18 : vector<8x4xf32>
      %20 = math.tanh %19 : vector<8x4xf32>
      %cst_16 = arith.constant 5.000000e-01 : f32
      %21 = vector.broadcast %cst_16 : f32 to vector<8x4xf32>
      %22 = arith.mulf %21, %20 : vector<8x4xf32>
      %cst_17 = arith.constant 5.000000e-01 : f32
      %23 = vector.broadcast %cst_17 : f32 to vector<8x4xf32>
      %24 = arith.addf %22, %23 : vector<8x4xf32>
      %c0_18 = arith.constant 0 : index
      %c0_19 = arith.constant 0 : index
      %25 = vector.load %arg6[%c0_18, %c0_19] : memref<8x4xf32, #tpu.memory_space<vmem>>, vector<8x4xf32>
      tpu.vector_store %arg6[%c0_18, %c0_19], %24 {strides = array<i32>} : memref<8x4xf32, #tpu.memory_space<vmem>>, vector<8x4xf32>,
    } else {
    }
    return
  }
  func.func @transform_0(%arg0: i32, %arg1: i32) -> i32 {
    %c0_i32 = arith.constant 0 : i32
    %c0_i32_0 = arith.constant 0 : i32
    return %c0_i32 : i32
  }
  func.func @transform_1(%arg0: i32, %arg1: i32) -> (i32, i32) {
    %c0_i32 = arith.constant 0 : i32
    return %arg0, %arg1 : i32, i32
  }
  func.func @transform_2(%arg0: i32, %arg1: i32) -> (i32, i32) {
    %c0_i32 = arith.constant 0 : i32
    %c0_i32_0 = arith.constant 0 : i32
    %c0_i32_1 = arith.constant 0 : i32
    return %c0_i32, %c0_i32_0 : i32, i32
  }
  func.func @transform_3(%arg0: i32, %arg1: i32) -> (i32, i32) {
    %c0_i32 = arith.constant 0 : i32
    %c0_i32_0 = arith.constant 0 : i32
    %c0_i32_1 = arith.constant 0 : i32
    return %c0_i32, %c0_i32_0 : i32, i32
  }
  func.func @transform_4(%arg0: i32, %arg1: i32) -> (i32, i32) {
    %c0_i32 = arith.constant 0 : i32
    %c0_i32_0 = arith.constant 0 : i32
    return %arg0, %c0_i32 : i32, i32
  }
}

</mosaic_0001>

<bundles_post_ra>
// kernel: tpu_custom_call.1
= control target key start
LH: loop header
LB: loop body
LE: loop exit
PB: predicated region body
PF: predicated region fallthrough
CT: control target
= control target key end

     0   :  { %vm23_vm0 = vcmask 31744   ;;  %v119_v2 = vmov 0.0   ;;  %vm43_vm1 = vcmask 261120   ;;  %s166_s2 = inlined_call_operand.vmem [shape: bf16[32,4], index: 2, kind: input, shape index: {}]   ;;  %s167_s0 = inlined_call_operand.<no memory space> [shape: f32[1], index: 0, kind: input, shape index: {}]   ;;  %s168_s1 = inlined_call_operand.vmem [shape: bf16[8,32], index: 1, kind: input, shape index: {}]   ;;  %s169_s3 = inlined_call_operand.vmem [shape: f32[1,4], index: 3, kind: input, shape index: {}]   ;;  %s170_s4 = inlined_call_operand.vmem [shape: f32[8,4], index: 4, kind: output, shape index: {}]  }
   0x1   :  { %v110_v0 = vld [vmem:[%s166_s2 + $0x8] sm:$0xff]  ;;  %v73_v1 = vstv %s167_s0  ;;  %24 = vst.msk [vmem:[#allocation2] sm:$0xff] %vm23_vm0, %v119_v2  ;;  %v109_v3 = vld [vmem:[%s166_s2] sm:$0xff] }
   0x2   :  { %115 = vrcp.f32 %v73_v1  ;;  %53 = vmatpush.bf16.msra.mxu0 %v110_v0  ;;  %v26_v4 = vld [vmem:[%s168_s1] sm:$0xf]  ;;  %v85_v7 = vand.u32 2147483648, %v73_v1  ;;  %vm79_vm2 = vweird.f32 %v73_v1  ;;  %v83_v9 = vand.u32 2147483647, %v73_v1 }
   0x3   :  { %v114_v18 = vld [vmem:[%s169_s3] ss:$0 sm:$0xff] }
   0x4   :  { %v86_v11 = vor.u32 1.1754944e-38, %v85_v7  ;;  %vm84_vm5 = vcmp.eq.f32.partialorder %v83_v9, 8.507059e+37 }
   0x6   :  { %54 = vmatpush.bf16.msra.mxu0 %v109_v3 }
   0x8   :  { %v116_v5 = vpop.eup %115  ;;  %v25_v15 = vld [vmem:[#allocation2] sm:$0xff] }
   0x9   :  { %v75_v6 = vmul.f32 %v116_v5, %v73_v1  ;;  %108 = vmatmul.msk.bf16.vlgmr.msra.gmra.mxu0 %vm43_vm1, %v26_v4  ;;  %vm80_vm3 = vweird.f32 %v116_v5 }
   0xa   :  { %vm81_vm4 = vmor %vm79_vm2, %vm80_vm3 }
   0xb   :  { %v76_v8 = vsub.f32 1.0, %v75_v6 }
   0xd   :  { %v77_v10 = vmul.f32 %v116_v5, %v76_v8 }
   0xf   :  { %v78_v12 = vadd.f32 %v116_v5, %v77_v10 }
  0x11   :  { %v82_v13 = vsel %vm81_vm4, %v116_v5, %v78_v12 }
  0x12   :  { %v87_v14 = vsel %vm84_vm5, %v86_v11, %v82_v13 }
  0x13   :  { %111 = vpush %v87_v14 }
  0x44   :  { %s112_s0 = spop %111 }
  0x45   :  { %s89_s1 = smul.f32 0.5, %s112_s0 }
  0x47   :  { %v90_v21 = vstv %s89_s1 }
  0x86   :  { %v56_v16 = vpop.f32.mrf.mxu0 }
  0x87   :  { %v60_v17 = vadd.f32 %v56_v16, %v25_v15 }
  0x89   :  { %62 = vst.msk [vmem:[#allocation2] sm:$0xff] %vm23_vm0, %v60_v17 }
  0x8e   :  { %v58_v19 = vpop.f32.mrf.mxu0 }
  0x90   :  { %v66_v20 = vld [vmem:[#allocation2] sm:$0xff] }
  0x91   :  { %v71_v22 = vadd.f32 %v114_v18, %v66_v20 }
  0x93   :  { %v91_v23 = vmul.f32 %v90_v21, %v71_v22 }
  0x95   :  { %117 = vtanh.f32 %v91_v23 }
  0x9b   :  { %v118_v24 = vpop.eup %117 }
  0x9c   :  { %v93_v25 = vmul.f32 0.5, %v118_v24 }
  0x9e   :  { %v94_v26 = vadd.f32 0.5, %v93_v25 }
  0xa0   :  { %95 = vst.msk [vmem:[%s170_s4] sm:$0xff] %vm23_vm0, %v94_v26 }

</bundles_post_ra>
